<compile_context>
chip_gen: v7x
topology: tpu7x:2x2x1
jax: 0.10.0
libtpu: 0.0.40
codegen_flags: <defaults>
</compile_context>

<pallas_src>
import jax
import jax.numpy as jnp
from jax.experimental import pallas as pl
from jax.experimental.pallas import tpu as pltpu


# --------------------------------- kernel ---------------------------------


def make_koopman_kernel(n_enc_layers, n_dec_layers, chunk, n_chunks, mxu_dtype):
    """Kernel factory.

    Ref layout (per grid step, batch tile = tb = chunk * n_chunks):
      x_ref  : [tb, n0]   row-major initial state
      u_ref  : [tb, nu]   row-major control input
      enc    : (W [out, in], b [out, 1]) per encoder layer
      Wkx    : [k_out, n0]      K columns acting on x
      Wkl    : [k_out, n_lift]  K columns acting on the lifted state
      Wku    : [k_out, nu]      K columns acting on u
      dec    : (W [out, in], b [out, 1]) per decoder layer
      out_ref: [out_dim, tb]    transposed (lane-dense) output
    """

    def kernel(*refs):
        idx = 0
        x_ref = refs[idx]; idx += 1
        u_ref = refs[idx]; idx += 1
        enc = []
        for _ in range(n_enc_layers):
            enc.append((refs[idx], refs[idx + 1])); idx += 2
        wkx_ref, wkl_ref, wku_ref = refs[idx], refs[idx + 1], refs[idx + 2]; idx += 3
        dec = []
        for _ in range(n_dec_layers):
            dec.append((refs[idx], refs[idx + 1])); idx += 2
        out_ref = refs[idx]

        def mm(w_ref, act):
            # W [out, in] @ act [in, chunk] -> [out, chunk]; bf16/f32 MXU feed,
            # f32 accumulation.
            return jnp.dot(w_ref[...], act.astype(mxu_dtype),
                           preferred_element_type=jnp.float32)

        def compute_chunk(off):
            # Load a lane-chunk of rows and move the batch onto the 128-lane
            # axis.  x/u are only 4/2 features wide, so these are the narrow
            # arrays — cheapest to transpose.  Transpose in the input dtype,
            # then cast for the MXU.
            xs = x_ref[pl.ds(off, chunk), :]                 # [chunk, n0]
            xt = xs.T.astype(mxu_dtype)                      # [n0, chunk]
            us = u_ref[pl.ds(off, chunk), :]                 # [chunk, nu]
            ut = us.T.astype(mxu_dtype)                      # [nu, chunk]

            # ---- encoder: (Linear -> ReLU) per layer -> lifted state ----
            h = xt
            for w_ref, b_ref in enc:
                # bias [out, 1] broadcasts along lanes; elementwise stays f32
                h = jnp.maximum(mm(w_ref, h) + b_ref[...], 0.0)
            lifted = h                                       # [n_lift, chunk] f32

            # ---- linear_system K (bias-free): both concats folded into dots ----
            z = mm(wkx_ref, xt) + mm(wkl_ref, lifted) + mm(wku_ref, ut)

            # ---- decoder: (ReLU -> Linear) per layer ----
            d = z
            for w_ref, b_ref in dec:
                d = mm(w_ref, jnp.maximum(d, 0.0)) + b_ref[...]

            out_ref[:, pl.ds(off, chunk)] = d.astype(out_ref.dtype)

        if n_chunks == 1:
            compute_chunk(0)
        else:
            # Inner lane-chunk loop bounds vreg live ranges for large tiles.
            def body(j, carry):
                compute_chunk(pl.multiple_of(j * chunk, chunk))
                return carry
            jax.lax.fori_loop(0, n_chunks, body, 0, unroll=True)

    return kernel


# --------------------------------- wrapper ---------------------------------


def _pick_batch_tile(B, target_steps=8, max_tile=2048):
    """Target ~target_steps grid steps (amortise the ~0.35us/step overhead),
    tile a multiple of 128 (batch is the lane axis), capped so the unrolled
    inner chunk loop stays short (<= 8 chunks of 256 lanes)."""
    tb = -(-B // target_steps)                  # ceil
    tb = ((tb + 127) // 128) * 128              # round up to lane multiple
    return max(128, min(tb, max_tile))


def koopman_forward(x, u, params, *, batch_tile=None, lane_chunk=256,
                    mxu_dtype=jnp.bfloat16, transposed_output=False):
    """Koopman forward pass via pallas_call.

    x: [B, n0] initial state, u: [B, nu] control input.
    params: {"enc": [(W[out,in], b[out])...], "Wk": [k_out, n0+n_lift+nu],
             "dec": [(W[out,in], b[out])...]}   (PyTorch weight layout)
    Returns [B, out_dim] (or [out_dim, B] if transposed_output=True, which
    skips the final wrapper transpose for pipelines kept in [features, B]).
    """
    B, n0 = x.shape
    nu = u.shape[1]
    n_lift = params["enc"][-1][0].shape[0]
    out_dim = params["dec"][-1][0].shape[0]

    tb = _pick_batch_tile(B) if batch_tile is None else int(batch_tile)
    if tb % 128 != 0:
        raise ValueError("batch_tile must be a multiple of 128 (batch = lane axis)")

    # ---- pad the batch to a tile multiple (padded rows are inert) ----
    n_steps = -(-B // tb)
    B_pad = n_steps * tb
    if B_pad != B:
        x = jnp.pad(x, ((0, B_pad - B), (0, 0)))
        u = jnp.pad(u, ((0, B_pad - B), (0, 0)))

    chunk = lane_chunk if (tb % lane_chunk == 0) else tb
    n_chunks = tb // chunk

    # ---- parameter prep (tiny, one-time, outside the kernel) ----
    enc_wb = [(jnp.asarray(W, mxu_dtype),
               jnp.asarray(b, jnp.float32).reshape(-1, 1))
              for (W, b) in params["enc"]]

    Wk = jnp.asarray(params["Wk"], jnp.float32)              # [k_out, n0+n_lift+nu]
    Wkx = Wk[:, :n0].astype(mxu_dtype)                       # acts on x
    Wkl = Wk[:, n0:n0 + n_lift].astype(mxu_dtype)            # acts on lifted state
    Wku = Wk[:, n0 + n_lift:].astype(mxu_dtype)              # acts on u

    dec_wb = [(jnp.asarray(W, mxu_dtype),
               jnp.asarray(b, jnp.float32).reshape(-1, 1))
              for (W, b) in params["dec"]]

    # ---- specs ----
    def full_spec(a):
        # Small grid-invariant parameter: whole array resident in VMEM, same
        # block every step (Pallas skips the re-DMA since the index is constant).
        nd = a.ndim
        return pl.BlockSpec(a.shape, lambda i, _nd=nd: (0,) * _nd)

    flat_inputs = [x, u]
    in_specs = [pl.BlockSpec((tb, n0), lambda i: (i, 0)),
                pl.BlockSpec((tb, nu), lambda i: (i, 0))]
    for W, b in enc_wb:
        flat_inputs += [W, b]
        in_specs += [full_spec(W), full_spec(b)]
    flat_inputs += [Wkx, Wkl, Wku]
    in_specs += [full_spec(Wkx), full_spec(Wkl), full_spec(Wku)]
    for W, b in dec_wb:
        flat_inputs += [W, b]
        in_specs += [full_spec(W), full_spec(b)]

    # ---- cost estimate (helps XLA schedule the custom call) ----
    flops = 0
    for W, _ in enc_wb:
        flops += 2 * B_pad * W.shape[0] * W.shape[1]
    for W in (Wkx, Wkl, Wku):
        flops += 2 * B_pad * W.shape[0] * W.shape[1]
    for W, _ in dec_wb:
        flops += 2 * B_pad * W.shape[0] * W.shape[1]
    bytes_accessed = (int(x.size) * x.dtype.itemsize
                      + int(u.size) * u.dtype.itemsize
                      + B_pad * out_dim * 4
                      + sum(int(a.size) * a.dtype.itemsize for a in flat_inputs[2:]))
    cost = pl.CostEstimate(flops=int(flops), transcendentals=0,
                           bytes_accessed=int(bytes_accessed))

    kernel = make_koopman_kernel(len(enc_wb), len(dec_wb), chunk, n_chunks, mxu_dtype)

    out_t = pl.pallas_call(
        kernel,
        out_shape=jax.ShapeDtypeStruct((out_dim, B_pad), jnp.float32),
        grid=(n_steps,),
        in_specs=in_specs,
        out_specs=pl.BlockSpec((out_dim, tb), lambda i: (0, i)),
        compiler_params=pltpu.CompilerParams(
            # 1-D batch grid: independent steps -> "parallel" so v7x can shard
            # the (>=4-step) grid across its two TensorCores.
            dimension_semantics=("parallel",),
            vmem_limit_bytes=32 * 1024 * 1024,   # safe on v5e/v6e/v7x; buffers are tiny
        ),
        cost_estimate=cost,
    )(*flat_inputs)

    if transposed_output:
        return out_t[:, :B]          # [out_dim, B] lane-dense, no extra XLA pass
    return out_t[:, :B].T            # [B, out_dim]


# ------------- deterministic parameter construction (no checkpoint) -------------


def init_linear(key, in_f, out_f, bias=True):
    """torch.nn.Linear default init (uniform +-1/sqrt(fan_in)); W kept [out, in]."""
    kw, kb = jax.random.split(key)
    bound = 1.0 / (in_f ** 0.5)
    W = jax.random.uniform(kw, (out_f, in_f), jnp.float32, -bound, bound)
    b = jax.random.uniform(kb, (out_f,), jnp.float32, -bound, bound) if bias else None
    return W, b


def build_params(key, en_struct, de_struct):
    n0 = en_struct[0]
    n_lift = en_struct[-1]
    assert de_struct[0] == n0 + n_lift, "de_struct[0] must equal en_struct[0] + en_struct[-1]"

    params = {"enc": [], "dec": []}
    # encoder: Linear + ReLU per pair
    for i in range(len(en_struct) - 1):
        key, k = jax.random.split(key)
        params["enc"].append(init_linear(k, en_struct[i], en_struct[i + 1], bias=True))
    # linear_system K: Linear(de0 + 2 -> de0, bias=False), type='unmasked'
    key, k = jax.random.split(key)
    Wk, _ = init_linear(k, de_struct[0] + 2, de_struct[0], bias=False)   # [out, in]
    params["Wk"] = Wk
    # decoder: ReLU + Linear per pair
    for i in range(len(de_struct) - 1):
        key, k = jax.random.split(key)
        params["dec"].append(init_linear(k, de_struct[i], de_struct[i + 1], bias=True))
    return params


def reference_forward(x, u, params):
    """Pure-JAX reference matching the PyTorch Koopman.forward semantics."""
    h = x
    for W, b in params["enc"]:
        h = jnp.maximum(h @ W.T + b.reshape(1, -1), 0.0)
    enc_out = jnp.concatenate([x, h], axis=-1)
    k_in = jnp.concatenate([enc_out, u], axis=-1)
    z = k_in @ params["Wk"].T
    d = z
    for W, b in params["dec"]:
        d = jnp.maximum(d, 0.0)
        d = d @ W.T + b.reshape(1, -1)
    return d


if __name__ == "__main__":
    # shapes consistent with the module:
    #   en_struct = [4, 16, 12]  -> encoder output dim = 4 + 12 = 16
    #   de_struct = [16, 16, 4]  -> prediction dim = 4
    # B = 1000 is not a multiple of 128 on purpose: it exercises the padding
    # path, the 8-step grid and (with batch_tile=1024) the inner chunk loop.
    en_struct = [4, 16, 12]
    de_struct = [16, 16, 4]
    B = 1000

    key = jax.random.PRNGKey(0)
    kx, ku, kp = jax.random.split(key, 3)
    x = jax.random.normal(kx, (B, en_struct[0]), jnp.float32)
    u = jax.random.normal(ku, (B, 2), jnp.float32)
    params = build_params(kp, en_struct, de_struct)
    ref = reference_forward(x, u, params)

    # 1) f32 MXU path, auto tiling (tb=128 -> 8 grid steps, single-chunk body)
    out_f32 = jax.block_until_ready(koopman_forward(x, u, params,
                                                    mxu_dtype=jnp.float32))
    assert out_f32.shape == (B, de_struct[-1])
    assert jnp.allclose(out_f32, ref, atol=1e-4, rtol=1e-4), "f32 path mismatch vs reference"

    # 2) default bf16 MXU feeds (f32 accumulation / elementwise), auto tiling
    out_bf16 = jax.block_until_ready(koopman_forward(x, u, params))
    assert out_bf16.shape == (B, de_struct[-1])
    assert jnp.allclose(out_bf16, ref, atol=5e-2, rtol=5e-2), "bf16 path mismatch vs reference"

    # 3) f32 path with a large explicit tile -> exercises the unrolled
    #    inner lane-chunk loop (tb=1024, 4 chunks of 256 lanes)
    out_big = jax.block_until_ready(koopman_forward(x, u, params,
                                                    batch_tile=1024,
                                                    mxu_dtype=jnp.float32))
    assert jnp.allclose(out_big, ref, atol=1e-4, rtol=1e-4), "chunked path mismatch vs reference"

    print("KERNEL_OK")
</pallas_src>

<mosaic_0001>
module attributes {stable_mosaic.version = 11 : i64} {
  func.func @kernel(%arg0: i32, %arg1: memref<128x4xf32, #tpu.memory_space<vmem>>, %arg2: memref<128x2xf32, #tpu.memory_space<vmem>>, %arg3: memref<16x4xf32, #tpu.memory_space<vmem>>, %arg4: memref<16x1xf32, #tpu.memory_space<vmem>>, %arg5: memref<12x16xf32, #tpu.memory_space<vmem>>, %arg6: memref<12x1xf32, #tpu.memory_space<vmem>>, %arg7: memref<16x4xf32, #tpu.memory_space<vmem>>, %arg8: memref<16x12xf32, #tpu.memory_space<vmem>>, %arg9: memref<16x2xf32, #tpu.memory_space<vmem>>, %arg10: memref<16x16xf32, #tpu.memory_space<vmem>>, %arg11: memref<16x1xf32, #tpu.memory_space<vmem>>, %arg12: memref<4x16xf32, #tpu.memory_space<vmem>>, %arg13: memref<4x1xf32, #tpu.memory_space<vmem>>, %arg14: memref<4x128xf32, #tpu.memory_space<vmem>>) attributes {dimension_semantics = [#tpu.dimension_semantics<parallel>], iteration_bounds = array<i64: 8>, scalar_prefetch = 0 : i64, scratch_operands = 0 : i64, tpu.core_type = #tpu.core_type<tc>, window_params = [{transform_indices = @transform_0, window_bounds = array<i64: 128, 4>}, {transform_indices = @transform_1, window_bounds = array<i64: 128, 2>}, {pipeline_mode = #tpu.pipeline_mode<synchronous>, transform_indices = @transform_2, window_bounds = array<i64: 16, 4>}, {pipeline_mode = #tpu.pipeline_mode<synchronous>, transform_indices = @transform_3, window_bounds = array<i64: 16, 1>}, {pipeline_mode = #tpu.pipeline_mode<synchronous>, transform_indices = @transform_4, window_bounds = array<i64: 12, 16>}, {pipeline_mode = #tpu.pipeline_mode<synchronous>, transform_indices = @transform_5, window_bounds = array<i64: 12, 1>}, {pipeline_mode = #tpu.pipeline_mode<synchronous>, transform_indices = @transform_6, window_bounds = array<i64: 16, 4>}, {pipeline_mode = #tpu.pipeline_mode<synchronous>, transform_indices = @transform_7, window_bounds = array<i64: 16, 12>}, {pipeline_mode = #tpu.pipeline_mode<synchronous>, transform_indices = @transform_8, window_bounds = array<i64: 16, 2>}, {pipeline_mode = #tpu.pipeline_mode<synchronous>, transform_indices = @transform_9, window_bounds = array<i64: 16, 16>}, {pipeline_mode = #tpu.pipeline_mode<synchronous>, transform_indices = @transform_10, window_bounds = array<i64: 16, 1>}, {pipeline_mode = #tpu.pipeline_mode<synchronous>, transform_indices = @transform_11, window_bounds = array<i64: 4, 16>}, {pipeline_mode = #tpu.pipeline_mode<synchronous>, transform_indices = @transform_12, window_bounds = array<i64: 4, 1>}, {transform_indices = @transform_13, window_bounds = array<i64: 4, 128>}]} {
    %c0 = arith.constant 0 : index
    %c0_0 = arith.constant 0 : index
    %0 = vector.load %arg1[%c0, %c0_0] : memref<128x4xf32, #tpu.memory_space<vmem>>, vector<128x4xf32>
    %1 = tpu.transpose %0, [1, 0] : vector<128x4xf32> -> vector<4x128xf32>
    %c0_1 = arith.constant 0 : index
    %c0_2 = arith.constant 0 : index
    %2 = vector.load %arg2[%c0_1, %c0_2] : memref<128x2xf32, #tpu.memory_space<vmem>>, vector<128x2xf32>
    %3 = tpu.transpose %2, [1, 0] : vector<128x2xf32> -> vector<2x128xf32>
    %c0_3 = arith.constant 0 : index
    %c0_4 = arith.constant 0 : index
    %4 = vector.load %arg3[%c0_3, %c0_4] : memref<16x4xf32, #tpu.memory_space<vmem>>, vector<16x4xf32>
    %cst = arith.constant dense<0.000000e+00> : vector<16x128xf32>
    %5 = tpu.matmul %4, %1, %cst {dimension_numbers = #tpu.dot_dimension_numbers<[1], [0], [0], [1], [0, 0, 1, 1], [], []>} : vector<16x4xf32>, vector<4x128xf32>, vector<16x128xf32> -> vector<16x128xf32>
    %c0_5 = arith.constant 0 : index
    %c0_6 = arith.constant 0 : index
    %6 = vector.load %arg4[%c0_5, %c0_6] : memref<16x1xf32, #tpu.memory_space<vmem>>, vector<16x1xf32>
    %7 = vector.broadcast %6 : vector<16x1xf32> to vector<16x128xf32>
    %8 = arith.addf %5, %7 : vector<16x128xf32>
    %cst_7 = arith.constant 0.000000e+00 : f32
    %9 = vector.broadcast %cst_7 : f32 to vector<16x128xf32>
    %10 = arith.maximumf %8, %9 : vector<16x128xf32>
    %c0_8 = arith.constant 0 : index
    %c0_9 = arith.constant 0 : index
    %11 = vector.load %arg5[%c0_8, %c0_9] : memref<12x16xf32, #tpu.memory_space<vmem>>, vector<12x16xf32>
    %cst_10 = arith.constant dense<0.000000e+00> : vector<12x128xf32>
    %12 = tpu.matmul %11, %10, %cst_10 {dimension_numbers = #tpu.dot_dimension_numbers<[1], [0], [0], [1], [0, 0, 1, 1], [], []>} : vector<12x16xf32>, vector<16x128xf32>, vector<12x128xf32> -> vector<12x128xf32>
    %c0_11 = arith.constant 0 : index
    %c0_12 = arith.constant 0 : index
    %13 = vector.load %arg6[%c0_11, %c0_12] : memref<12x1xf32, #tpu.memory_space<vmem>>, vector<12x1xf32>
    %14 = vector.broadcast %13 : vector<12x1xf32> to vector<12x128xf32>
    %15 = arith.addf %12, %14 : vector<12x128xf32>
    %cst_13 = arith.constant 0.000000e+00 : f32
    %16 = vector.broadcast %cst_13 : f32 to vector<12x128xf32>
    %17 = arith.maximumf %15, %16 : vector<12x128xf32>
    %c0_14 = arith.constant 0 : index
    %c0_15 = arith.constant 0 : index
    %18 = vector.load %arg7[%c0_14, %c0_15] : memref<16x4xf32, #tpu.memory_space<vmem>>, vector<16x4xf32>
    %cst_16 = arith.constant dense<0.000000e+00> : vector<16x128xf32>
    %19 = tpu.matmul %18, %1, %cst_16 {dimension_numbers = #tpu.dot_dimension_numbers<[1], [0], [0], [1], [0, 0, 1, 1], [], []>} : vector<16x4xf32>, vector<4x128xf32>, vector<16x128xf32> -> vector<16x128xf32>
    %c0_17 = arith.constant 0 : index
    %c0_18 = arith.constant 0 : index
    %20 = vector.load %arg8[%c0_17, %c0_18] : memref<16x12xf32, #tpu.memory_space<vmem>>, vector<16x12xf32>
    %cst_19 = arith.constant dense<0.000000e+00> : vector<16x128xf32>
    %21 = tpu.matmul %20, %17, %cst_19 {dimension_numbers = #tpu.dot_dimension_numbers<[1], [0], [0], [1], [0, 0, 1, 1], [], []>} : vector<16x12xf32>, vector<12x128xf32>, vector<16x128xf32> -> vector<16x128xf32>
    %22 = arith.addf %19, %21 : vector<16x128xf32>
    %c0_20 = arith.constant 0 : index
    %c0_21 = arith.constant 0 : index
    %23 = vector.load %arg9[%c0_20, %c0_21] : memref<16x2xf32, #tpu.memory_space<vmem>>, vector<16x2xf32>
    %cst_22 = arith.constant dense<0.000000e+00> : vector<16x128xf32>
    %24 = tpu.matmul %23, %3, %cst_22 {dimension_numbers = #tpu.dot_dimension_numbers<[1], [0], [0], [1], [0, 0, 1, 1], [], []>} : vector<16x2xf32>, vector<2x128xf32>, vector<16x128xf32> -> vector<16x128xf32>
    %25 = arith.addf %22, %24 : vector<16x128xf32>
    %cst_23 = arith.constant 0.000000e+00 : f32
    %26 = vector.broadcast %cst_23 : f32 to vector<16x128xf32>
    %27 = arith.maximumf %25, %26 : vector<16x128xf32>
    %c0_24 = arith.constant 0 : index
    %c0_25 = arith.constant 0 : index
    %28 = vector.load %arg10[%c0_24, %c0_25] : memref<16x16xf32, #tpu.memory_space<vmem>>, vector<16x16xf32>
    %cst_26 = arith.constant dense<0.000000e+00> : vector<16x128xf32>
    %29 = tpu.matmul %28, %27, %cst_26 {dimension_numbers = #tpu.dot_dimension_numbers<[1], [0], [0], [1], [0, 0, 1, 1], [], []>} : vector<16x16xf32>, vector<16x128xf32>, vector<16x128xf32> -> vector<16x128xf32>
    %c0_27 = arith.constant 0 : index
    %c0_28 = arith.constant 0 : index
    %30 = vector.load %arg11[%c0_27, %c0_28] : memref<16x1xf32, #tpu.memory_space<vmem>>, vector<16x1xf32>
    %31 = vector.broadcast %30 : vector<16x1xf32> to vector<16x128xf32>
    %32 = arith.addf %29, %31 : vector<16x128xf32>
    %cst_29 = arith.constant 0.000000e+00 : f32
    %33 = vector.broadcast %cst_29 : f32 to vector<16x128xf32>
    %34 = arith.maximumf %32, %33 : vector<16x128xf32>
    %c0_30 = arith.constant 0 : index
    %c0_31 = arith.constant 0 : index
    %35 = vector.load %arg12[%c0_30, %c0_31] : memref<4x16xf32, #tpu.memory_space<vmem>>, vector<4x16xf32>
    %cst_32 = arith.constant dense<0.000000e+00> : vector<4x128xf32>
    %36 = tpu.matmul %35, %34, %cst_32 {dimension_numbers = #tpu.dot_dimension_numbers<[1], [0], [0], [1], [0, 0, 1, 1], [], []>} : vector<4x16xf32>, vector<16x128xf32>, vector<4x128xf32> -> vector<4x128xf32>
    %c0_33 = arith.constant 0 : index
    %c0_34 = arith.constant 0 : index
    %37 = vector.load %arg13[%c0_33, %c0_34] : memref<4x1xf32, #tpu.memory_space<vmem>>, vector<4x1xf32>
    %38 = vector.broadcast %37 : vector<4x1xf32> to vector<4x128xf32>
    %39 = arith.addf %36, %38 : vector<4x128xf32>
    %c0_35 = arith.constant 0 : index
    %c0_36 = arith.constant 0 : index
    %40 = vector.load %arg14[%c0_35, %c0_36] : memref<4x128xf32, #tpu.memory_space<vmem>>, vector<4x128xf32>
    tpu.vector_store %arg14[%c0_35, %c0_36], %39 {strides = array<i32>} : memref<4x128xf32, #tpu.memory_space<vmem>>, vector<4x128xf32>,
    return
  }
  func.func @transform_0(%arg0: i32) -> (i32, i32) {
    %c0_i32 = arith.constant 0 : i32
    %c0_i32_0 = arith.constant 0 : i32
    return %arg0, %c0_i32 : i32, i32
  }
  func.func @transform_1(%arg0: i32) -> (i32, i32) {
    %c0_i32 = arith.constant 0 : i32
    %c0_i32_0 = arith.constant 0 : i32
    return %arg0, %c0_i32 : i32, i32
  }
  func.func @transform_2(%arg0: i32) -> (i32, i32) {
    %c0_i32 = arith.constant 0 : i32
    %c0_i32_0 = arith.constant 0 : i32
    %c0_i32_1 = arith.constant 0 : i32
    return %c0_i32, %c0_i32_0 : i32, i32
  }
  func.func @transform_3(%arg0: i32) -> (i32, i32) {
    %c0_i32 = arith.constant 0 : i32
    %c0_i32_0 = arith.constant 0 : i32
    %c0_i32_1 = arith.constant 0 : i32
    return %c0_i32, %c0_i32_0 : i32, i32
  }
  func.func @transform_4(%arg0: i32) -> (i32, i32) {
    %c0_i32 = arith.constant 0 : i32
    %c0_i32_0 = arith.constant 0 : i32
    %c0_i32_1 = arith.constant 0 : i32
    return %c0_i32, %c0_i32_0 : i32, i32
  }
  func.func @transform_5(%arg0: i32) -> (i32, i32) {
    %c0_i32 = arith.constant 0 : i32
    %c0_i32_0 = arith.constant 0 : i32
    %c0_i32_1 = arith.constant 0 : i32
    return %c0_i32, %c0_i32_0 : i32, i32
  }
  func.func @transform_6(%arg0: i32) -> (i32, i32) {
    %c0_i32 = arith.constant 0 : i32
    %c0_i32_0 = arith.constant 0 : i32
    %c0_i32_1 = arith.constant 0 : i32
    return %c0_i32, %c0_i32_0 : i32, i32
  }
  func.func @transform_7(%arg0: i32) -> (i32, i32) {
    %c0_i32 = arith.constant 0 : i32
    %c0_i32_0 = arith.constant 0 : i32
    %c0_i32_1 = arith.constant 0 : i32
    return %c0_i32, %c0_i32_0 : i32, i32
  }
  func.func @transform_8(%arg0: i32) -> (i32, i32) {
    %c0_i32 = arith.constant 0 : i32
    %c0_i32_0 = arith.constant 0 : i32
    %c0_i32_1 = arith.constant 0 : i32
    return %c0_i32, %c0_i32_0 : i32, i32
  }
  func.func @transform_9(%arg0: i32) -> (i32, i32) {
    %c0_i32 = arith.constant 0 : i32
    %c0_i32_0 = arith.constant 0 : i32
    %c0_i32_1 = arith.constant 0 : i32
    return %c0_i32, %c0_i32_0 : i32, i32
  }
  func.func @transform_10(%arg0: i32) -> (i32, i32) {
    %c0_i32 = arith.constant 0 : i32
    %c0_i32_0 = arith.constant 0 : i32
    %c0_i32_1 = arith.constant 0 : i32
    return %c0_i32, %c0_i32_0 : i32, i32
  }
  func.func @transform_11(%arg0: i32) -> (i32, i32) {
    %c0_i32 = arith.constant 0 : i32
    %c0_i32_0 = arith.constant 0 : i32
    %c0_i32_1 = arith.constant 0 : i32
    return %c0_i32, %c0_i32_0 : i32, i32
  }
  func.func @transform_12(%arg0: i32) -> (i32, i32) {
    %c0_i32 = arith.constant 0 : i32
    %c0_i32_0 = arith.constant 0 : i32
    %c0_i32_1 = arith.constant 0 : i32
    return %c0_i32, %c0_i32_0 : i32, i32
  }
  func.func @transform_13(%arg0: i32) -> (i32, i32) {
    %c0_i32 = arith.constant 0 : i32
    %c0_i32_0 = arith.constant 0 : i32
    return %c0_i32, %arg0 : i32, i32
  }
}

</mosaic_0001>

<bundles_post_ra>
// kernel: tpu_custom_call.1
= control target key start
LH: loop header
LB: loop body
LE: loop exit
PB: predicated region body
PF: predicated region fallthrough
CT: control target
= control target key end

     0   :  { %s2263_s0 = inlined_call_operand.vmem [shape: f32[1024,4], index: 0, kind: input, shape index: {}]   ;;  %s2264_s1 = inlined_call_operand.vmem [shape: f32[1024,2], index: 1, kind: input, shape index: {}]   ;;  %s2265_s2 = inlined_call_operand.vmem [shape: f32[16,4], index: 2, kind: input, shape index: {}]   ;;  %s2266_s3 = inlined_call_operand.vmem [shape: f32[16,1], index: 3, kind: input, shape index: {}]   ;;  %s2267_s4 = inlined_call_operand.vmem [shape: f32[12,16], index: 4, kind: input, shape index: {}]   ;;  %s2268_s5 = inlined_call_operand.vmem [shape: f32[12,1], index: 5, kind: input, shape index: {}]   ;;  %s2269_s6 = inlined_call_operand.vmem [shape: f32[16,4], index: 6, kind: input, shape index: {}]   ;;  %s2270_s7 = inlined_call_operand.vmem [shape: f32[16,12], index: 7, kind: input, shape index: {}]   ;;  %s2271_s8 = inlined_call_operand.vmem [shape: f32[16,2], index: 8, kind: input, shape index: {}]   ;;  %s2272_s9 = inlined_call_operand.vmem [shape: f32[16,16], index: 9, kind: input, shape index: {}]   ;;  %s2273_s10 = inlined_call_operand.vmem [shape: f32[16,1], index: 10, kind: input, shape index: {}]   ;;  %s2274_s11 = inlined_call_operand.vmem [shape: f32[4,16], index: 11, kind: input, shape index: {}]   ;;  %s2275_s12 = inlined_call_operand.vmem [shape: f32[4,1], index: 12, kind: input, shape index: {}]   ;;  %s2276_s13 = inlined_call_operand.hbm [shape: f32[4,1024], index: 13, kind: output, shape index: {}]  }
   0x1   :  { %2278 = sst [smem:[#allocation5_spill]] %s2263_s0 }
   0x2   :  { %2279 = sst [smem:[#allocation6_spill]] %s2265_s2 }
   0x3   :  { %2280 = sst [smem:[#allocation7_spill]] %s2266_s3 }
   0x4   :  { %18 = vsyncpa [#allocation3], 0 }
   0x5   :  { %20 = vsyncpa [#allocation3 + $0x1], 0  ;;  %s1937_s25 = smov 0   ;;  %s1939_s26 = smov 0  }
   0x6   :  { %s1941_s27 = smov 0   ;;  %s1943_s28 = smov 0  }
   0x7 LB: > { %s1958_s29 = sadd.s32 4294967295, %s1859_s28   ;;  %s1309_s30 = sadd.s32 4294967294, %s1859_s28   ;;  %s1859_s28 = sphi %s1943_s28, %s2294_s28   ;;  %s1855_s27 = sphi %s1941_s27, %s2293_s27   ;;  %s1851_s26 = sphi %s1939_s26, %s2292_s26   ;;  %s1847_s25 = sphi %s1937_s25, %s2291_s25  }
   0x8   : > { %s1962_s14 = sadd.s32 1, %s1859_s28   ;;  %s316_s15 = sadd.s32 1, %s1855_s27 }
   0x9   : > { %s313_s16 = ssub.s32 %s1859_s28, %s1962_s14  ;;  %p326_p0 = scmp.ne.s32.totalorder %s1855_s27, %s1851_s26 }
   0xa   : > { %p314_p1 = scmp.eq.s32.totalorder %s313_s16, 0  ;;  %p327_p2 = scmp.eq.s32.totalorder %s1958_s29, 7 }
   0xb   : > { %p332_p3 = scmp.ne.s32.totalorder %s1851_s26, %s1847_s25  ;;  %p333_p4 = scmp.eq.s32.totalorder %s1309_s30, 7 }
   0xc   : > { %s1973_s17 = scalar_select %p314_p1, %s1855_s27, %s316_s15  }
   0xd   : > { %p1975_p5 = por %p327_p2, %p326_p0  ;;  %p1979_p6 = por %p333_p4, %p332_p3 }
   0xe   : > { %p1312_p7 = scmp.ge.s32.totalorder %s1859_s28, 1  ;;  %p402_p8 = scmp.lt.s32.totalorder %s1859_s28, 9 }
  0x10   : > { %p403_p9 = pnand %p1312_p7, %p402_p8 }
  0x11   : > { %s1314_s20 = sshll.u32 (!%p403_p9), %s1958_s29, 4  ;;  %vm509_vm0 = vcmask (!%p403_p9), 31744   ;;  %s2283_s2 = sld [smem:[#allocation6_spill]] (!%p403_p9)  ;;  %v1861_v2 = vmov (!%p403_p9), 0   ;;  %v1048_v5 = vld [vmem:[%s2273_s10] sm:$0xff] (!%p403_p9)  ;;  %vm655_vm2 = vcmask (!%p403_p9), 130048  }
  0x12   : > { %406 = sbr.rel (%p403_p9) target bundleno = 1214 (0x4be), region = 72  ;;  %s2284_s3 = sld [smem:[#allocation7_spill]] (!%p403_p9)  ;;  %1795 = vset.pattern.permute.xlu0 (!%p403_p9), %v1861_v2  ;;  %1796 = vset.pattern.permute.xlu1 (!%p403_p9), %v1861_v2  ;;  %vm2008_vm1 = vmpackc.low (!%p403_p9), %vm509_vm0, %vm509_vm0  ;;  %v1144_v12 = vld [vmem:[%s2275_s12] sm:$0xf] (!%p403_p9)  ;;  %v644_v34 = vld [vmem:[%s2268_s5 + $0x8] sm:$0xf] (!%p403_p9) }
  0x13   : > { %p452_p10 = scmp.lt.s32.totalorder (!%p403_p9), %s1314_s20, 127  ;;  %s2285_s0 = sld [smem:[#allocation5_spill]] (!%p403_p9)  ;;  %v641_v32 = vld [vmem:[%s2267_s4] sm:$0xff] (!%p403_p9)  ;;  %vm912_vm3 = vcmask (!%p403_p9), 15360   ;;  %v740_v40 = vld [vmem:[%s2269_s6 + $0x8] sm:$0xff] (!%p403_p9)  ;;  %vm743_vm5 = vcmask (!%p403_p9), 97280  }
  0x14   : > { %v643_v33 = vld [vmem:[%s2268_s5] sm:$0xff] (!%p403_p9)  ;;  %vm2127_vm4 = vmpackc.low (!%p403_p9), %vm912_vm3, %vm912_vm3  ;;  %v1049_v44 = vld [vmem:[%s2273_s10 + $0x8] sm:$0xff] (!%p403_p9)  ;;  %vm750_vm6 = vcmask (!%p403_p9), 1043456   ;;  %vm1862_vm7 = vmmov (!%p403_p9), 1   ;;  %vm1864_vm9 = vmmov (!%p403_p9), 0   ;;  %s448_s24 = sand.u32 (!%p403_p9), 1, %s1851_s26  }
  0x15   : > { %647 = vperm.xlu1 (!%p403_p9), %1796, %v643_v33   ;;  %v739_v35 = vld [vmem:[%s2269_s6] sm:$0xff] (!%p403_p9)  ;;  %vm1639_vm8 = vmpackc.low (!%p403_p9), %vm750_vm6, %vm1862_vm7  ;;  %v1863_v33 = vmov (!%p403_p9), 0.0|0.0   ;;  %s1313_s30 = sshll.u32 (!%p403_p9), %s448_s24, 2  ;;  %s1225_s22 = scalar_lea.sflag (!%p403_p9), [#allocation3], %s448_s24 }
  0x16   : > { %1534 = vmatprep.mubr.msk.f32.mxu1 (!%p403_p9), %vm509_vm0, %v739_v35  ;;  %v910_v47 = vld [vmem:[%s2271_s8] sm:$0xff] (!%p403_p9) }
  0x17   : > { %v495_v0 = vld [vmem:[%s2283_s2] sm:$0xff] (!%p403_p9)  ;;  %v496_v31 = vld [vmem:[%s2283_s2 + $0x8] sm:$0xff] (!%p403_p9) }
  0x18   : > { %v497_v1 = vld [vmem:[%s2284_s3] sm:$0xff] (!%p403_p9)  ;;  %1485 = vmatprep.mubr.msk.f32.mxu0 (!%p403_p9), %vm509_vm0, %v495_v0  ;;  %v498_v3 = vld [vmem:[%s2284_s3 + $0x8] sm:$0xff] (!%p403_p9) }
  0x19   : > { %501 = vperm.xlu0 %1795, %v497_v1   ;;  %s2296_s20 = smov (!%p452_p10, %s1314_s20), 127  ;;  %652 = vperm.xlu1 %1796, %v644_v34   ;;  %v911_v0 = vld [vmem:[%s2271_s8 + $0x8] sm:$0xff]  ;;  %v1865_v34 = vmov 0.0  }
  0x1a   : > { %s2277_s16 = sshll.u32 %s2296_s20, 3  ;;  %s2288_s3 = sshll.u32 %s2296_s20, 3 }
  0x1b   : > { %s2004_s23 = scalar_lea.vmem %s2285_s0, %s2277_s16  ;;  %s2117_s2 = scalar_lea.vmem %s2264_s1, %s2288_s3 }
  0x1c   : > { %v463_v6 = vld [vmem:[%s2004_s23] sm:$0xff]  ;;  %v464_v7 = vld [vmem:[%s2004_s23 + $0x8] sm:$0xff]  ;;  %v465_v8 = vld [vmem:[%s2004_s23 + $0x10] sm:$0xff]  ;;  %s1381_s0 = sshll.u32 %s1958_s29, 6  ;;  %s450_s3 = scalar_lea.vmem [#allocation2], %s1313_s30 }
  0x1d   : > { %506 = vperm.xlu0 %1795, %v498_v3   ;;  %v1586_v9 = vpack.c.bf16 %v464_v7, %v463_v6  ;;  %v466_v10 = vld [vmem:[%s2004_s23 + $0x18] sm:$0xff]  ;;  %v467_v13 = vld [vmem:[%s2004_s23 + $0x20] sm:$0xff]  ;;  %v468_v14 = vld [vmem:[%s2004_s23 + $0x28] sm:$0xff]  ;;  %1057 = vperm.xlu1 %1796, %v1049_v44   ;;  %s1238_s20 = sshll.u32 %s450_s3, 4  ;;  %s2221_s21 = scalar_lea.hbm %s2276_s13, %s1381_s0  ;;  %s2223_s20 = int_to_ptr.vmem [resolvable:$true] %s1238_s20 }
  0x1e   : > { %v1592_v11 = vpack.c.bf16 %v466_v10, %v465_v8  ;;  %v1598_v15 = vpack.c.bf16 %v468_v14, %v467_v13  ;;  %v469_v16 = vld [vmem:[%s2004_s23 + $0x30] sm:$0xff]  ;;  %v470_v17 = vld [vmem:[%s2004_s23 + $0x38] sm:$0xff]  ;;  %v471_v19 = vld [vmem:[%s2004_s23 + $0x40] sm:$0xff]  ;;  %s1866_s29 = smov [#allocation2]  }
  0x1f   : > { %1588 = vmatprep.subr.msk.bf16.mxu0 %vm2008_vm1, %v1586_v9  ;;  %1646 = vmatprep.subr.msk.bf16.mxu1 %vm2008_vm1, %v1586_v9  ;;  %v1604_v18 = vpack.c.bf16 %v470_v17, %v469_v16  ;;  %v472_v20 = vld [vmem:[%s2004_s23 + $0x48] sm:$0xff]  ;;  %v473_v22 = vld [vmem:[%s2004_s23 + $0x50] sm:$0xff]  ;;  %v474_v23 = vld [vmem:[%s2004_s23 + $0x58] sm:$0xff] }
  0x20   : > { %1591 = vmatpush3.bf16.xpose.msk.msra.mxu0 %vm2008_vm1, %v1586_v9  ;;  %1649 = vmatpush3.bf16.xpose.msk.msra.mxu1 %vm2008_vm1, %v1586_v9  ;;  %v1610_v21 = vpack.c.bf16 %v472_v20, %v471_v19  ;;  %v1616_v24 = vpack.c.bf16 %v474_v23, %v473_v22  ;;  %v475_v25 = vld [vmem:[%s2004_s23 + $0x60] sm:$0xff]  ;;  %v476_v26 = vld [vmem:[%s2004_s23 + $0x68] sm:$0xff]  ;;  %v477_v28 = vld [vmem:[%s2004_s23 + $0x70] sm:$0xff] }
  0x21   : > { %1052 = vperm.xlu0 %1795, %v1048_v5   ;;  %1594 = vmatprep.subr.msk.bf16.mxu0 %vm2008_vm1, %v1592_v11  ;;  %v1622_v27 = vpack.c.bf16 %v476_v26, %v475_v25  ;;  %v478_v29 = vld [vmem:[%s2004_s23 + $0x78] sm:$0xff]  ;;  %v479_v36 = vld [vmem:[%s2117_s2] sm:$0xff]  ;;  %v480_v37 = vld [vmem:[%s2117_s2 + $0x8] sm:$0xff]  ;;  %s1797_s23 = scalar_lea.vmem %s2223_s20, 64 }
  0x22   : > { %1652 = vmatprep.subr.msk.bf16.mxu1 %vm2008_vm1, %v1592_v11  ;;  %v1628_v30 = vpack.c.bf16 %v478_v29, %v477_v28  ;;  %v1692_v38 = vpack.c.bf16 %v480_v37, %v479_v36  ;;  %v481_v41 = vld [vmem:[%s2117_s2 + $0x10] sm:$0xff]  ;;  %v482_v42 = vld [vmem:[%s2117_s2 + $0x18] sm:$0xff]  ;;  %v483_v45 = vld [vmem:[%s2117_s2 + $0x20] sm:$0xff]  ;;  %p1798_p11 = scmp.ne.s32.totalorder %s2223_s20, %s1797_s23 }
  0x23   : > { %v1698_v43 = vpack.c.bf16 %v482_v42, %v481_v41  ;;  %v484_v46 = vld [vmem:[%s2117_s2 + $0x28] sm:$0xff]  ;;  %v485_v49 = vld [vmem:[%s2117_s2 + $0x30] sm:$0xff]  ;;  %v486_v50 = vld [vmem:[%s2117_s2 + $0x38] sm:$0xff] }
  0x24   : > { %v1704_v48 = vpack.c.bf16 %v484_v46, %v483_v45  ;;  %v1710_v51 = vpack.c.bf16 %v486_v50, %v485_v49  ;;  %v487_v52 = vld [vmem:[%s2117_s2 + $0x40] sm:$0xff]  ;;  %v488_v53 = vld [vmem:[%s2117_s2 + $0x48] sm:$0xff]  ;;  %v489_v55 = vld [vmem:[%s2117_s2 + $0x50] sm:$0xff]  ;;  %p1799_p12 = pnand %p1798_p11, %p1975_p5 }
  0x25   : > { %1147 = vperm.xlu0 %1795, %v1144_v12   ;;  %v1716_v54 = vpack.c.bf16 %v488_v53, %v487_v52  ;;  %v490_v56 = vld [vmem:[%s2117_s2 + $0x58] sm:$0xff]  ;;  %v491_v58 = vld [vmem:[%s2117_s2 + $0x60] sm:$0xff]  ;;  %v492_v59 = vld [vmem:[%s2117_s2 + $0x68] sm:$0xff] }
  0x26   : > { %v1722_v57 = vpack.c.bf16 %v490_v56, %v489_v55  ;;  %v1728_v60 = vpack.c.bf16 %v492_v59, %v491_v58  ;;  %v493_v61 = vld [vmem:[%s2117_s2 + $0x70] sm:$0xff]  ;;  %v494_v62 = vld [vmem:[%s2117_s2 + $0x78] sm:$0xff]  ;;  %v642_v10 = vld [vmem:[%s2267_s4 + $0x8] sm:$0xf]  ;;  %p1800_p13 = pneg %p1799_p12  ;;  %s1801_s2 = sshll.u32 %s1866_s29, 4  ;;  %s1802_s2 = int_to_ptr.vmem [resolvable:$false] %s1801_s2 }
  0x27   : > { %v1734_v63 = vpack.c.bf16 %v494_v62, %v493_v61  ;;  %v742_v23 = vld [vmem:[%s2270_s7 + $0x8] sm:$0xff]  ;;  %v1143_v44 = vld [vmem:[%s2274_s11] sm:$0xf]  ;;  %s1803_s30 = scalar_lea.vmem %s1802_s2, 128  ;;  %p1804_p0 = scmp.lt.s32.totalorder %s2223_s20, %s1802_s2 }
  0x28   : > { %1597 = vmatpush3.bf16.xpose.msk.msra.mxu0 %vm2008_vm1, %v1592_v11  ;;  %1655 = vmatpush3.bf16.xpose.msk.msra.mxu1 %vm2008_vm1, %v1592_v11  ;;  %v741_v11 = vld [vmem:[%s2270_s7] sm:$0xff]  ;;  %p1805_p1 = scmp.lt.s32.totalorder %s1803_s30, %s1797_s23 }
  0x29   : > { %1600 = vmatprep.subr.msk.bf16.mxu0 %vm2008_vm1, %v1598_v15  ;;  %1658 = vmatprep.subr.msk.bf16.mxu1 %vm2008_vm1, %v1598_v15 }
  0x2a   : > { %p1806_p2 = por %p1805_p1, %p1804_p0 }
  0x2c   : > { %p1807_p3 = pnand %p1806_p2, %p1800_p13 }
  0x30   : > { %1603 = vmatpush3.bf16.xpose.msk.msra.mxu0 %vm2008_vm1, %v1598_v15  ;;  %1661 = vmatpush3.bf16.xpose.msk.msra.mxu1 %vm2008_vm1, %v1598_v15 }
  0x31   : > { %1606 = vmatprep.subr.msk.bf16.mxu0 %vm2008_vm1, %v1604_v18  ;;  %1664 = vmatprep.subr.msk.bf16.mxu1 %vm2008_vm1, %v1604_v18 }
  0x38   : > { %1609 = vmatpush3.bf16.xpose.msk.msra.mxu0 %vm2008_vm1, %v1604_v18  ;;  %1667 = vmatpush3.bf16.xpose.msk.msra.mxu1 %vm2008_vm1, %v1604_v18 }
  0x39   : > { %1612 = vmatprep.subr.msk.bf16.mxu0 %vm2008_vm1, %v1610_v21  ;;  %1670 = vmatprep.subr.msk.bf16.mxu1 %vm2008_vm1, %v1610_v21 }
  0x40   : > { %1615 = vmatpush3.bf16.xpose.msk.msra.mxu0 %vm2008_vm1, %v1610_v21  ;;  %1673 = vmatpush3.bf16.xpose.msk.msra.mxu1 %vm2008_vm1, %v1610_v21 }
  0x41   : > { %1618 = vmatprep.subr.msk.bf16.mxu0 %vm2008_vm1, %v1616_v24  ;;  %1676 = vmatprep.subr.msk.bf16.mxu1 %vm2008_vm1, %v1616_v24 }
  0x48   : > { %1621 = vmatpush3.bf16.xpose.msk.msra.mxu0 %vm2008_vm1, %v1616_v24  ;;  %1679 = vmatpush3.bf16.xpose.msk.msra.mxu1 %vm2008_vm1, %v1616_v24  ;;  %v1046_v24 = vld [vmem:[%s2272_s9] sm:$0xff] }
  0x49   : > { %1624 = vmatprep.subr.msk.bf16.mxu0 %vm2008_vm1, %v1622_v27  ;;  %1682 = vmatprep.subr.msk.bf16.mxu1 %vm2008_vm1, %v1622_v27 }
  0x50   : > { %1627 = vmatpush3.bf16.xpose.msk.msra.mxu0 %vm2008_vm1, %v1622_v27  ;;  %1685 = vmatpush3.bf16.xpose.msk.msra.mxu1 %vm2008_vm1, %v1622_v27 }
  0x51   : > { %1630 = vmatprep.subr.msk.bf16.mxu0 %vm2008_vm1, %v1628_v30  ;;  %1688 = vmatprep.subr.msk.bf16.mxu1 %vm2008_vm1, %v1628_v30 }
  0x58   : > { %1633 = vmatpush3.bf16.xpose.msk.msra.mxu0 %vm2008_vm1, %v1628_v30  ;;  %1691 = vmatpush3.bf16.xpose.msk.msra.mxu1 %vm2008_vm1, %v1628_v30 }
  0x59   : > { %1694 = vmatprep.subr.msk.bf16.mxu1 %vm2127_vm4, %v1692_v38 }
  0x5f   : > { %1486 = vmatmul.mubr.msk.f32.vlgmr.msra.gmra.mrb[0].mxu0 %vm509_vm0, %v496_v31  ;;  %1535 = vmatmul.mubr.msk.f32.vlgmr.msra.gmra.mrb[0].mxu1 %vm509_vm0, %v740_v40 }
  0x60   : > { %1492 = vmatprep.mubr.msk.f32.mxu0 %vm655_vm2, %v641_v32  ;;  %1697 = vmatpush3.bf16.xpose.msk.msra.mxu1 %vm2127_vm4, %v1692_v38  ;;  %v1047_v32 = vld [vmem:[%s2272_s9 + $0x8] sm:$0xff] }
  0x61   : > { %1700 = vmatprep.subr.msk.bf16.mxu1 %vm2127_vm4, %v1698_v43  ;;  %1569 = vmatprep.mubr.msk.f32.mxu1 %vm912_vm3, %v910_v47 }
  0x68   : > { %1703 = vmatpush3.bf16.xpose.msk.msra.mxu1 %vm2127_vm4, %v1698_v43 }
  0x69   : > { %1706 = vmatprep.subr.msk.bf16.mxu1 %vm2127_vm4, %v1704_v48 }
  0x70   : > { %1709 = vmatpush3.bf16.xpose.msk.msra.mxu1 %vm2127_vm4, %v1704_v48 }
  0x71   : > { %1712 = vmatprep.subr.msk.bf16.mxu1 %vm2127_vm4, %v1710_v51 }
  0x78   : > { %1715 = vmatpush3.bf16.xpose.msk.msra.mxu1 %vm2127_vm4, %v1710_v51 }
  0x79   : > { %1718 = vmatprep.subr.msk.bf16.mxu1 %vm2127_vm4, %v1716_v54 }
  0x80   : > { %1721 = vmatpush3.bf16.xpose.msk.msra.mxu1 %vm2127_vm4, %v1716_v54 }
  0x81   : > { %1724 = vmatprep.subr.msk.bf16.mxu1 %vm2127_vm4, %v1722_v57 }
  0x88   : > { %1727 = vmatpush3.bf16.xpose.msk.msra.mxu1 %vm2127_vm4, %v1722_v57 }
  0x89   : > { %1730 = vmatprep.subr.msk.bf16.mxu1 %vm2127_vm4, %v1728_v60 }
  0x90   : > { %1733 = vmatpush3.bf16.xpose.msk.msra.mxu1 %vm2127_vm4, %v1728_v60 }
  0x91   : > { %1736 = vmatprep.subr.msk.bf16.mxu1 %vm2127_vm4, %v1734_v63 }
  0x94   : > { %v648_v14 = vpop.permute.xlu1 %647 }
  0x98   : > { %1739 = vmatpush3.bf16.xpose.msk.msra.mxu1 %vm2127_vm4, %v1734_v63  ;;  %v502_v1 = vpop.permute.xlu0 %501  ;;  %v653_v15 = vpop.permute.xlu1 %652 }
  0x9c   : > { %v507_v2 = vpop.permute.xlu0 %506  ;;  %v1058_v35 = vpop.permute.xlu1 %1057 }
  0x9f   : > { %1570 = vmatmul.mubr.msk.f32.vlgmr.msra.gmra.mrb[0].mxu1 %vm912_vm3, %v911_v0 }
  0xa0   : > { %v1053_v37 = vpop.permute.xlu0 %1052 }
  0xa4   : > { %v1148_v45 = vpop.permute.xlu0 %1147 }
 0x132   : > { %v1487_v3 = vpop.f32.mrb[0].mxu0 }
 0x133   : > { %v636_v4 = vadd.f32 %v1487_v3, %v507_v2  ;;  %v630_v5 = vpop.f32.mrb[1].mxu0 }
 0x134   : > { %v631_v6 = vadd.f32 %v630_v5, %v502_v1 }
 0x135   : > { %v640_v7 = vmax.f32 %v636_v4, 0.0 }
 0x136   : > { %v639_v8 = vmax.f32 %v631_v6, 0.0 }
 0x138   : > { %v1634_v9 = vpack.c.bf16 %v640_v7, %v639_v8 }
 0x13a   : > { %1635 = vmatprep.subr.bf16.mxu0 %v1634_v9 }
 0x13b   : > { %1637 = vmatpush3.bf16.msra.mxu0 %v1634_v9 }
 0x13e   : > { %1493 = vmatmul.mubr.msk.f32.vlgmr.msra.gmra.mrb[2].mxu0 %vm655_vm2, %v642_v10 }
 0x13f   : > { %1499 = vmatprep.mubr.msk.f32.mxu0 %vm743_vm5, %v741_v11 }
 0x172   : > { %v1571_v12 = vpop.f32.mrb[0].mxu1 }
 0x173   : > { %v1033_v13 = vpop.f32.mrb[1].mxu1 }
 0x211   : > { %v1494_v16 = vpop.f32.mrb[2].mxu0 }
 0x212   : > { %v734_v17 = vadd.f32 %v1494_v16, %v653_v15  ;;  %v728_v18 = vpop.f32.mrb[3].mxu0 }
 0x213   : > { %v729_v19 = vadd.f32 %v728_v18, %v648_v14 }
 0x214   : > { %v738_v20 = vmax.f32 %v734_v17, 0.0 }
 0x215   : > { %v737_v21 = vmax.f32 %v729_v19, 0.0 }
 0x217   : > { %v1638_v22 = vpack.c.bf16 %v738_v20, %v737_v21 }
 0x219   : > { %1640 = vmatprep.subr.msk.bf16.mxu0 %vm1639_vm8, %v1638_v22 }
 0x21a   : > { %1643 = vmatpush3.bf16.msk.msra.mxu0 %vm1639_vm8, %v1638_v22 }
 0x21d   : > { %1500 = vmatmul.mubr.msk.f32.vlgmr.msra.gmra.mrb[4].mxu0 %vm743_vm5, %v742_v23 }
 0x21e   : > { %1576 = vmatprep.mubr.msk.f32.mxu0 %vm655_vm2, %v1046_v24 }
 0x2f0   : > { %v1501_v25 = vpop.f32.mrb[4].mxu0 }
 0x2f1   : > { %v1747_v26 = vadd.f32 %v1571_v12, %v1501_v25  ;;  %v820_v27 = vpop.f32.mrb[5].mxu0 }
 0x2f2   : > { %v1748_v28 = vadd.f32 %v1033_v13, %v820_v27 }
 0x2f3   : > { %v1045_v29 = vmax.f32 %v1747_v26, 0.0 }
 0x2f4   : > { %v1044_v30 = vmax.f32 %v1748_v28, 0.0 }
 0x2f6   : > { %v1740_v31 = vpack.c.bf16 %v1045_v29, %v1044_v30 }
 0x2f8   : > { %1741 = vmatprep.subr.bf16.mxu0 %v1740_v31 }
 0x2f9   : > { %1743 = vmatpush3.bf16.msra.mxu0 %v1740_v31 }
 0x2fa   : > { %1744 = vmatprep.subr.bf16.mxu0 %v1863_v33 }
 0x2fc   : > { %1577 = vmatmul.mubr.msk.f32.vlgmr.msra.gmra.mrb[6].mxu0 %vm655_vm2, %v1047_v32 }
 0x2fd   : > { %1583 = vmatprep.mubr.msk.f32.mxu0 %vm1864_vm9, %v1865_v34 }
 0x3cf   : > { %v1578_v36 = vpop.f32.mrb[6].mxu0 }
 0x3d0   : > { %v1138_v38 = vadd.f32 %v1578_v36, %v1058_v35  ;;  %v1132_v39 = vpop.f32.mrb[7].mxu0 }
 0x3d1   : > { %v1133_v40 = vadd.f32 %v1132_v39, %v1053_v37 }
 0x3d2   : > { %v1142_v41 = vmax.f32 %v1138_v38, 0.0 }
 0x3d3   : > { %v1141_v42 = vmax.f32 %v1133_v40, 0.0 }
 0x3d5   : > { %v1745_v43 = vpack.c.bf16 %v1142_v41, %v1141_v42 }
 0x3d7   : > { %1746 = vmatpush3.bf16.msra.mxu0 %v1745_v43 }
 0x3da   : > { %1584 = vmatmul.mubr.msk.f32.vlgmr.msra.gmra.mrb[8].mxu0 %vm655_vm2, %v1143_v44 }
 0x4ad   : > { %v1219_v46 = vpop.f32.mrb[8].mxu0 }
 0x4ae   : > { %v1220_v47 = vadd.f32 %v1219_v46, %v1148_v45  ;;  %v1585_v48 = vpop.f32.mrb[9].mxu0 }
 0x4b0   : > { %1223 = vst [vmem:[%s450_s3] sm:$0xf] %v1220_v47 }
 0x4b1   : > { %1810 = shalt.err (!%p1807_p3)
}
 0x4b2   : > { %s1811_s24 = scalar_lea.hbm %s2221_s21, 64  ;;  %s1815_s16 = scalar_lea.hbm %s2276_s13, 512 }
 0x4b3   : > { %p1812_p4 = scmp.ne.s32.totalorder %s2221_s21, %s1811_s24  ;;  %p1816_p9 = scmp.lt.u32.totalorder %s2221_s21, %s2276_s13 }
 0x4b4   : > { %p1817_p10 = scmp.lt.u32.totalorder %s1815_s16, %s1811_s24  ;;  %p1819_p12 = scmp.lt.u32.totalorder %s1811_s24, %s2221_s21 }
 0x4b5   : > { %p1813_p7 = pnand %p1812_p4, %p1975_p5 }
 0x4b6   : > { %p1818_p11 = por %p1817_p10, %p1816_p9 }
 0x4b7   : > { %p1814_p8 = pneg %p1813_p7 }
 0x4b8   : > { %p1820_p13 = por %p1819_p12, %p1818_p11 }
 0x4ba   : > { %p1821_p0 = pnand %p1820_p13, %p1814_p8 }
 0x4bc   : > { %1824 = shalt.err (!%p1821_p0)
}
 0x4bd   : > { %1751 = dma.vmem_to_hbm [thread:$0]  (%p1975_p5), %s2223_s20, 64, %s2221_s21, %s1225_s22  }
 0x4be PF: > { %p1757_p1 = scmp.ge.s32.totalorder %s1859_s28, 2  ;;  %s1250_s23 = sand.u32 1, %s1847_s25  }
 0x4bf   : > { %s1251_s2 = scalar_lea.sflag [#allocation3], %s1250_s23 }
 0x4c0   : > { %p1754_p2 = pnand %p1757_p1, %p1979_p6 }
 0x4c2   : > { %1842 = dma.done.wait (!%p1754_p2), %s1251_s2, 64  }
 0x4c3   : > { %1844 = vsyncadd (!%p1754_p2), %s1251_s2, 4294967232  ;;  %p23_p3 = scmp.ge.s32.totalorder %s1962_s14, 10   ;;  %s2291_s25 = smov %s1851_s26 }
 0x4c4   : > { %s2292_s26 = smov %s1855_s27  ;;  %s2293_s27 = smov %s1973_s17 }
 0x4c5   : > { %s2294_s28 = smov %s1962_s14  ;;  %25 = sbr.rel (!%p23_p3) target bundleno = 7 (0x7), region = 110 }
 0x4cc   :  { %1256 = vsyncpa [#allocation3], 1 }
 0x4cd   :  { %1258 = vsyncpa [#allocation3 + $0x1], 1 }

</bundles_post_ra>
